<compile_context>
chip_gen: v7x
topology: tpu7x:2x2x1
jax: 0.10.0
libtpu: 0.0.40
codegen_flags: <defaults>
</compile_context>

<pallas_src>
import functools

import jax
import jax.numpy as jnp
from jax.experimental import pallas as pl
from jax.experimental.pallas import tpu as pltpu


def _round_up(a, b):
    return -(-a // b) * b


def _mlp_channel_kernel(x_ref, w1_ref, b1_ref, w2_ref, b2_ref, o_ref, *,
                        exact_gelu):
    # x_ref : (C, St)    w1_ref: (M, C)   b1_ref: (M, 1)
    # w2_ref: (C, M)     b2_ref: (C, 1)   o_ref : (C, St)
    x = x_ref[...]
    # Avoid mixed-dtype MXU inputs (bf16 weights x f32 acts would silently run
    # the MXU at the f32 rate).
    if x.dtype != w1_ref.dtype:
        x = x.astype(w1_ref.dtype)

    # fc1: channel mix, contraction over C; f32 accumulate on the MXU.
    h = jnp.dot(w1_ref[...], x, preferred_element_type=jnp.float32)
    h = h + b1_ref[...].astype(jnp.float32)

    if exact_gelu:
        # exact erf-based GELU (torch.nn.GELU() default)
        inv_sqrt2 = jnp.float32(0.7071067811865476)
        h = 0.5 * h * (1.0 + jax.lax.erf(h * inv_sqrt2))
    else:
        # tanh approximation: runs on the EUP (its own VLIW slot) instead of a
        # long VALU erf polynomial — useful only when compute-bound.
        h = jax.nn.gelu(h, approximate=True)

    # fc2 (cast the intermediate to the weight dtype so bf16 weights keep the
    # full MXU rate; no-op for f32 weights).
    y = jnp.dot(w2_ref[...], h.astype(w2_ref.dtype),
                preferred_element_type=jnp.float32)
    y = y + b2_ref[...].astype(jnp.float32)

    o_ref[...] = y.astype(o_ref.dtype)


def _choose_spatial_tile(S, N, C, M, x_itemsize,
                         target_tile_bytes=1 << 20,   # ~1 MiB x-tile per DMA
                         h_budget_bytes=8 << 20):     # cap on (M, st) f32 temp
    """Lane-dense spatial tile (multiple of 128), sized for the HBM-bound regime."""
    sublane = max(8, 32 // x_itemsize)            # f32 -> 8, bf16 -> 16, int8 -> 32
    c_pad = _round_up(max(C, 1), sublane)
    m_pad = _round_up(max(M, 1), 8)
    s_pad = _round_up(S, 128)

    # Aim for ~1 MiB of activation per grid step so DMA time, not the ~0.35 us
    # per-step overhead, dominates.
    st = (target_tile_bytes // (c_pad * x_itemsize)) // 128 * 128
    # Bound the non-pipelined (M_pad, st) f32 intermediate (critical on v7x's
    # 64 MiB VMEM).
    # TODO(synk): for very large mlp_dim, chunk M inside the kernel (fori_loop
    # with an f32 accumulator) instead of shrinking st.
    st_h = (h_budget_bytes // (m_pad * 4)) // 128 * 128
    st = max(128, min(st, st_h, s_pad))

    # v7x has 2 TensorCores: keep >= 2 grid steps on a parallel axis.
    if N == 1 and s_pad > 128 and pl.cdiv(S, st) < 2:
        st = max(128, _round_up(pl.cdiv(S, 2), 128))
    return st


def _vmem_limit_bytes(C, M, st, x_itemsize, w_itemsize):
    sublane = max(8, 32 // x_itemsize)
    c_pad = _round_up(max(C, 1), sublane)
    m_pad = _round_up(max(M, 1), 8)
    # double-buffered x + out tiles, f32 h temp, resident weights/biases.
    est = 2 * (2 * c_pad * st * x_itemsize)                      # x + out, x2 bufs
    est += m_pad * st * 4                                        # h intermediate
    est += (m_pad * _round_up(C, 128) + c_pad * _round_up(M, 128)) * w_itemsize
    est += (m_pad + c_pad) * 128 * w_itemsize                    # biases
    est = int(est * 1.25) + (2 << 20)                            # headroom
    return max(32 << 20, min(est, 48 << 20))                     # < v7x 64 MiB


@functools.partial(jax.jit, static_argnames=("s_tile", "exact_gelu"))
def mlp_channel(x, w1, b1, w2, b2, *, s_tile=None, exact_gelu=True):
    """MlpChannel forward.

    x : (N, C, D, H, W)
    w1: (M, C)  PyTorch fc1 weight (out, in), b1: (M,)
    w2: (C, M)  PyTorch fc2 weight (out, in), b2: (C,)
    Returns (N, C, D, H, W).
    """
    N, C, D, H, W = x.shape
    M = w1.shape[0]
    S = D * H * W

    # Free reshape: NCDHW is contiguous as (N, C, S); no data movement.
    xs = x.reshape(N, C, S)

    if s_tile is None:
        st = _choose_spatial_tile(S, N, C, M, x.dtype.itemsize)
    else:
        st = min(max(128, _round_up(int(s_tile), 128)), _round_up(S, 128))
    grid = (N, pl.cdiv(S, st))

    b1c = b1.reshape(M, 1)
    b2c = b2.reshape(C, 1)

    kernel = functools.partial(_mlp_channel_kernel, exact_gelu=exact_gelu)

    out = pl.pallas_call(
        kernel,
        out_shape=jax.ShapeDtypeStruct((N, C, S), x.dtype),
        grid_spec=pltpu.PrefetchScalarGridSpec(
            num_scalar_prefetch=0,
            grid=grid,
            in_specs=[
                # x: squeeze the batch dim, tile the spatial (lane) axis.
                pl.BlockSpec((None, C, st), lambda n, s: (n, 0, s)),
                pl.BlockSpec((M, C), lambda n, s: (0, 0)),   # w1 (resident)
                pl.BlockSpec((M, 1), lambda n, s: (0, 0)),   # b1
                pl.BlockSpec((C, M), lambda n, s: (0, 0)),   # w2 (resident)
                pl.BlockSpec((C, 1), lambda n, s: (0, 0)),   # b2
            ],
            out_specs=pl.BlockSpec((None, C, st), lambda n, s: (n, 0, s)),
        ),
        compiler_params=pltpu.CompilerParams(
            dimension_semantics=("parallel", "parallel"),
            vmem_limit_bytes=_vmem_limit_bytes(
                C, M, st, x.dtype.itemsize, w1.dtype.itemsize),
        ),
    )(xs, w1, b1c, w2, b2c)

    return out.reshape(N, C, D, H, W)


def init_params(key, hidden_size, mlp_dim, dtype=jnp.float32):
    """Deterministic synthetic params in PyTorch Conv3d(k=1) layout:
    fc1 weight (mlp_dim, hidden_size), fc2 weight (hidden_size, mlp_dim)."""
    k1, k2, k3, k4 = jax.random.split(key, 4)
    s1 = 1.0 / jnp.sqrt(hidden_size)   # fan_in of fc1
    s2 = 1.0 / jnp.sqrt(mlp_dim)       # fan_in of fc2
    w1 = jax.random.uniform(k1, (mlp_dim, hidden_size), dtype, -s1, s1)
    b1 = jax.random.uniform(k2, (mlp_dim,), dtype, -s1, s1)
    w2 = jax.random.uniform(k3, (hidden_size, mlp_dim), dtype, -s2, s2)
    b2 = jax.random.uniform(k4, (hidden_size,), dtype, -s2, s2)
    return w1, b1, w2, b2


if __name__ == "__main__":
    key = jax.random.PRNGKey(0)
    kx, kp = jax.random.split(key)

    # Small shapes consistent with MlpChannel(hidden_size=4, mlp_dim=32)
    N, C, D, H, W = 2, 4, 4, 8, 8
    mlp_dim = 32

    x = jax.random.normal(kx, (N, C, D, H, W), jnp.float32)
    w1, b1, w2, b2 = init_params(kp, C, mlp_dim)

    out = mlp_channel(x, w1, b1, w2, b2)
    jax.block_until_ready(out)

    # Pure-JAX reference of the same math (fc1 -> exact GELU -> fc2).
    xf = x.reshape(N, C, -1)                                       # (N, C, S)
    h = jnp.einsum("mc,ncs->nms", w1, xf) + b1[None, :, None]
    h = jax.nn.gelu(h, approximate=False)
    ref = jnp.einsum("cm,nms->ncs", w2, h) + b2[None, :, None]
    ref = ref.reshape(N, C, D, H, W)

    assert jnp.allclose(out, ref, atol=1e-5, rtol=1e-5), "mismatch vs reference"
    print("KERNEL_OK")
</pallas_src>

<mosaic_0001>
module attributes {stable_mosaic.version = 11 : i64} {
  func.func @_mlp_channel_kernel(%arg0: i32, %arg1: i32, %arg2: memref<1x4x256xf32, #tpu.memory_space<vmem>>, %arg3: memref<32x4xf32, #tpu.memory_space<vmem>>, %arg4: memref<32x1xf32, #tpu.memory_space<vmem>>, %arg5: memref<4x32xf32, #tpu.memory_space<vmem>>, %arg6: memref<4x1xf32, #tpu.memory_space<vmem>>, %arg7: memref<1x4x256xf32, #tpu.memory_space<vmem>>) attributes {dimension_semantics = [#tpu.dimension_semantics<parallel>, #tpu.dimension_semantics<parallel>], iteration_bounds = array<i64: 2, 1>, scalar_prefetch = 0 : i64, scratch_operands = 0 : i64, tpu.core_type = #tpu.core_type<tc>, window_params = [{transform_indices = @transform_0, window_bounds = array<i64: 1, 4, 256>}, {pipeline_mode = #tpu.pipeline_mode<synchronous>, transform_indices = @transform_1, window_bounds = array<i64: 32, 4>}, {pipeline_mode = #tpu.pipeline_mode<synchronous>, transform_indices = @transform_2, window_bounds = array<i64: 32, 1>}, {pipeline_mode = #tpu.pipeline_mode<synchronous>, transform_indices = @transform_3, window_bounds = array<i64: 4, 32>}, {pipeline_mode = #tpu.pipeline_mode<synchronous>, transform_indices = @transform_4, window_bounds = array<i64: 4, 1>}, {transform_indices = @transform_5, window_bounds = array<i64: 1, 4, 256>}]} {
    %c0 = arith.constant 0 : index
    %c0_0 = arith.constant 0 : index
    %c0_1 = arith.constant 0 : index
    %0 = vector.load %arg2[%c0, %c0_0, %c0_1] : memref<1x4x256xf32, #tpu.memory_space<vmem>>, vector<1x4x256xf32>
    %1 = vector.shape_cast %0 : vector<1x4x256xf32> to vector<4x256xf32>
    %c0_2 = arith.constant 0 : index
    %c0_3 = arith.constant 0 : index
    %2 = vector.load %arg3[%c0_2, %c0_3] : memref<32x4xf32, #tpu.memory_space<vmem>>, vector<32x4xf32>
    %cst = arith.constant dense<0.000000e+00> : vector<32x256xf32>
    %3 = tpu.matmul %2, %1, %cst {dimension_numbers = #tpu.dot_dimension_numbers<[1], [0], [0], [1], [0, 0, 1, 1], [], []>} : vector<32x4xf32>, vector<4x256xf32>, vector<32x256xf32> -> vector<32x256xf32>
    %c0_4 = arith.constant 0 : index
    %c0_5 = arith.constant 0 : index
    %4 = vector.load %arg4[%c0_4, %c0_5] : memref<32x1xf32, #tpu.memory_space<vmem>>, vector<32x1xf32>
    %5 = vector.broadcast %4 : vector<32x1xf32> to vector<32x256xf32>
    %6 = arith.addf %3, %5 : vector<32x256xf32>
    %cst_6 = arith.constant 5.000000e-01 : f32
    %7 = vector.broadcast %cst_6 : f32 to vector<32x256xf32>
    %8 = arith.mulf %7, %6 : vector<32x256xf32>
    %cst_7 = arith.constant 0.707106769 : f32
    %9 = vector.broadcast %cst_7 : f32 to vector<32x256xf32>
    %10 = arith.mulf %6, %9 : vector<32x256xf32>
    %11 = math.erf %10 : vector<32x256xf32>
    %cst_8 = arith.constant 1.000000e+00 : f32
    %12 = vector.broadcast %cst_8 : f32 to vector<32x256xf32>
    %13 = arith.addf %12, %11 : vector<32x256xf32>
    %14 = arith.mulf %8, %13 : vector<32x256xf32>
    %c0_9 = arith.constant 0 : index
    %c0_10 = arith.constant 0 : index
    %15 = vector.load %arg5[%c0_9, %c0_10] : memref<4x32xf32, #tpu.memory_space<vmem>>, vector<4x32xf32>
    %cst_11 = arith.constant dense<0.000000e+00> : vector<4x256xf32>
    %16 = tpu.matmul %15, %14, %cst_11 {dimension_numbers = #tpu.dot_dimension_numbers<[1], [0], [0], [1], [0, 0, 1, 1], [], []>} : vector<4x32xf32>, vector<32x256xf32>, vector<4x256xf32> -> vector<4x256xf32>
    %c0_12 = arith.constant 0 : index
    %c0_13 = arith.constant 0 : index
    %17 = vector.load %arg6[%c0_12, %c0_13] : memref<4x1xf32, #tpu.memory_space<vmem>>, vector<4x1xf32>
    %18 = vector.broadcast %17 : vector<4x1xf32> to vector<4x256xf32>
    %19 = arith.addf %16, %18 : vector<4x256xf32>
    %c0_14 = arith.constant 0 : index
    %c0_15 = arith.constant 0 : index
    %c0_16 = arith.constant 0 : index
    %20 = vector.load %arg7[%c0_14, %c0_15, %c0_16] : memref<1x4x256xf32, #tpu.memory_space<vmem>>, vector<1x4x256xf32>
    %21 = vector.shape_cast %20 : vector<1x4x256xf32> to vector<4x256xf32>
    %22 = vector.shape_cast %19 : vector<4x256xf32> to vector<1x4x256xf32>
    tpu.vector_store %arg7[%c0_14, %c0_15, %c0_16], %22 {strides = array<i32>} : memref<1x4x256xf32, #tpu.memory_space<vmem>>, vector<1x4x256xf32>,
    return
  }
  func.func @transform_0(%arg0: i32, %arg1: i32) -> (i32, i32, i32) {
    %c0_i32 = arith.constant 0 : i32
    %c0_i32_0 = arith.constant 0 : i32
    return %arg0, %c0_i32, %arg1 : i32, i32, i32
  }
  func.func @transform_1(%arg0: i32, %arg1: i32) -> (i32, i32) {
    %c0_i32 = arith.constant 0 : i32
    %c0_i32_0 = arith.constant 0 : i32
    %c0_i32_1 = arith.constant 0 : i32
    return %c0_i32, %c0_i32_0 : i32, i32
  }
  func.func @transform_2(%arg0: i32, %arg1: i32) -> (i32, i32) {
    %c0_i32 = arith.constant 0 : i32
    %c0_i32_0 = arith.constant 0 : i32
    %c0_i32_1 = arith.constant 0 : i32
    return %c0_i32, %c0_i32_0 : i32, i32
  }
  func.func @transform_3(%arg0: i32, %arg1: i32) -> (i32, i32) {
    %c0_i32 = arith.constant 0 : i32
    %c0_i32_0 = arith.constant 0 : i32
    %c0_i32_1 = arith.constant 0 : i32
    return %c0_i32, %c0_i32_0 : i32, i32
  }
  func.func @transform_4(%arg0: i32, %arg1: i32) -> (i32, i32) {
    %c0_i32 = arith.constant 0 : i32
    %c0_i32_0 = arith.constant 0 : i32
    %c0_i32_1 = arith.constant 0 : i32
    return %c0_i32, %c0_i32_0 : i32, i32
  }
  func.func @transform_5(%arg0: i32, %arg1: i32) -> (i32, i32, i32) {
    %c0_i32 = arith.constant 0 : i32
    %c0_i32_0 = arith.constant 0 : i32
    return %arg0, %c0_i32, %arg1 : i32, i32, i32
  }
}

</mosaic_0001>

<bundles_post_ra>
// kernel: mlp_channel.1
= control target key start
LH: loop header
LB: loop body
LE: loop exit
PB: predicated region body
PF: predicated region fallthrough
CT: control target
= control target key end

     0   :  { %s745_s18 = smov 0   ;;  %s747_s19 = smov 0   ;;  %s815_s0 = inlined_call_operand.vmem [shape: f32[2,4,256], index: 0, kind: input, shape index: {}]   ;;  %s816_s1 = inlined_call_operand.vmem [shape: f32[32,4], index: 1, kind: input, shape index: {}]   ;;  %s817_s2 = inlined_call_operand.vmem [shape: f32[32,1], index: 2, kind: input, shape index: {}]   ;;  %s818_s3 = inlined_call_operand.vmem [shape: f32[4,32], index: 3, kind: input, shape index: {}]   ;;  %s819_s4 = inlined_call_operand.vmem [shape: f32[4,1], index: 4, kind: input, shape index: {}]   ;;  %s820_s5 = inlined_call_operand.vmem [shape: f32[2,4,256], index: 5, kind: output, shape index: {}]  }
   0x1   :  { %s749_s20 = smov 0  }
   0x2 LB: > { %s27_s21 = sadd.s32 1, %s707_s19  ;;  %p620_p0 = scmp.ge.s32.totalorder %s711_s20, 1  ;;  %s711_s20 = sphi %s749_s20, %s15_s20   ;;  %s707_s19 = sphi %s747_s19, %s822_s19   ;;  %s703_s18 = sphi %s745_s18, %s821_s18  }
   0x3   : > { %p29_p1 = scmp.ge.s32.totalorder %s27_s21, 2  ;;  %p208_p2 = scmp.lt.s32.totalorder %s711_s20, 3 }
   0x5   : > { %s824_s21 = smov (%p29_p1, %s27_s21), 0  ;;  %p209_p3 = pnand %p620_p0, %p208_p2 }
   0x6   : > { %p245_p4 = scmp.lt.s32.totalorder (!%p209_p3), %s703_s18, 1  ;;  %v713_v0 = vmov (!%p209_p3), 0.0   ;;  %v269_v1 = vld [vmem:[%s817_s2] sm:$0xff] (!%p209_p3)  ;;  %v714_v2 = vmov (!%p209_p3), 0   ;;  %v271_v3 = vld [vmem:[%s817_s2 + $0x10] sm:$0xff] (!%p209_p3)  ;;  %v270_v4 = vld [vmem:[%s817_s2 + $0x8] sm:$0xff] (!%p209_p3) }
   0x7   : > { %212 = sbr.rel (%p209_p3) target bundleno = 490 (0x1ea), region = 40  ;;  %377 = vmatprep.mubr.f32.mxu0 (!%p209_p3), %v713_v0  ;;  %517 = vmatprep.mubr.f32.mxu1 (!%p209_p3), %v713_v0  ;;  %v272_v5 = vld [vmem:[%s817_s2 + $0x18] sm:$0xff] (!%p209_p3)  ;;  %vm308_vm0 = vcmask (!%p209_p3), 1043456   ;;  %v265_v8 = vld [vmem:[%s816_s1] sm:$0xff] (!%p209_p3)  ;;  %vm295_vm1 = vcmask (!%p209_p3), 31744   ;;  %v266_v10 = vld [vmem:[%s816_s1 + $0x8] sm:$0xff] (!%p209_p3) }
   0x8   : > { %670 = vset.pattern.permute.xlu0 (!%p209_p3), %v714_v2  ;;  %671 = vset.pattern.permute.xlu1 (!%p209_p3), %v714_v2  ;;  %v443_v9 = vld [vmem:[%s819_s4] sm:$0xf] (!%p209_p3)  ;;  %v267_v11 = vld [vmem:[%s816_s1 + $0x10] sm:$0xff] (!%p209_p3)  ;;  %v268_v12 = vld [vmem:[%s816_s1 + $0x18] sm:$0xff] (!%p209_p3)  ;;  %vm449_vm2 = vcmask (!%p209_p3), 261120  }
   0x9   : > { %275 = vperm.xlu0 (!%p209_p3), %670, %v269_v1   ;;  %285 = vperm.xlu1 (!%p209_p3), %671, %v271_v3  }
   0xd   : > { %280 = vperm.xlu0 (!%p209_p3), %670, %v270_v4   ;;  %290 = vperm.xlu1 (!%p209_p3), %671, %v272_v5  }
   0xe   : > { %s826_s18 = smov (!%p245_p4, %s703_s18), 1 }
   0xf   : > { %s634_s26 = sshll.u32 %s826_s18, 3 }
  0x10   : > { %s252_s8 = scalar_lea.vmem %s815_s0, %s634_s26  ;;  %s262_s28 = scalar_lea.vmem %s820_s5, %s634_s26 }
  0x11   : > { %v264_v6 = vld [vmem:[%s252_s8] sm:$0xff]  ;;  %446 = vperm.xlu0 %670, %v443_v9  }
  0x12   : > { %v294_v7 = vcombine.high %v264_v6, %v264_v6 }
  0x14   : > { %625 = vmatprep.subr.msk.mxu0 %vm308_vm0, %v294_v7 }
  0x15   : > { %626 = vmatpush1.msk.msra.mxu0 %vm308_vm0, %v264_v6 }
  0x16   : > { %627 = vmatmul.mubr.msk.f32.vlgmr.msra.gmra.mrb[0].mxu0 %vm295_vm1, %v265_v8 }
  0x17   : > { %383 = vmatprep.mubr.f32.mxu0 %v713_v0 }
  0x1a   : > { %628 = vmatmul.mubr.msk.f32.gmra.mrb[2].mxu0 %vm295_vm1, %v266_v10 }
  0x1b   : > { %389 = vmatprep.mubr.f32.mxu0 %v713_v0 }
  0x1e   : > { %629 = vmatmul.mubr.msk.f32.gmra.mrb[4].mxu0 %vm295_vm1, %v267_v11 }
  0x1f   : > { %395 = vmatprep.mubr.f32.mxu0 %v713_v0 }
  0x22   : > { %630 = vmatmul.mubr.msk.f32.gmra.mrb[6].mxu0 %vm295_vm1, %v268_v12 }
  0x88   : > { %v276_v13 = vpop.permute.xlu0 %275  ;;  %v286_v24 = vpop.permute.xlu1 %285 }
  0x8c   : > { %v281_v19 = vpop.permute.xlu0 %280  ;;  %v291_v33 = vpop.permute.xlu1 %290 }
  0xe9   : > { %v379_v14 = vpop.f32.mrb[0].mxu0 }
  0xea   : > { %v380_v15 = vadd.f32 %v379_v14, %v276_v13  ;;  %v381_v16 = vpop.f32.mrb[1].mxu0  ;;  %v447_v14 = vpop.permute.xlu0 %446 }
  0xeb   : > { %v382_v17 = vadd.f32 %v381_v16, %v276_v13  ;;  %v442_v13 = vld [vmem:[%s818_s3] sm:$0xf] }
  0xec   : > { %v410_v18 = vmul.f32 0.70710677, %v380_v15  ;;  %v402_v47 = vmul.f32 0.5, %v380_v15 }
  0xed   : > { %v411_v20 = vmul.f32 0.70710677, %v382_v17  ;;  %v385_v21 = vpop.f32.mrb[2].mxu0  ;;  %v403_v50 = vmul.f32 0.5, %v382_v17 }
  0xee   : > { %673 = verf.f32 %v410_v18  ;;  %v386_v22 = vadd.f32 %v385_v21, %v281_v19  ;;  %v387_v23 = vpop.f32.mrb[3].mxu0 }
  0xef   : > { %675 = verf.f32 %v411_v20  ;;  %v388_v25 = vadd.f32 %v387_v23, %v281_v19 }
  0xf0   : > { %v412_v26 = vmul.f32 0.70710677, %v386_v22  ;;  %v404_v48 = vmul.f32 0.5, %v386_v22 }
  0xf1   : > { %v413_v27 = vmul.f32 0.70710677, %v388_v25  ;;  %v391_v28 = vpop.f32.mrb[4].mxu0  ;;  %v405_v51 = vmul.f32 0.5, %v388_v25 }
  0xf2   : > { %677 = verf.f32 %v412_v26  ;;  %v392_v29 = vadd.f32 %v391_v28, %v286_v24  ;;  %v393_v30 = vpop.f32.mrb[5].mxu0 }
  0xf3   : > { %679 = verf.f32 %v413_v27  ;;  %v394_v31 = vadd.f32 %v393_v30, %v286_v24 }
  0xf4   : > { %v414_v32 = vmul.f32 0.70710677, %v392_v29  ;;  %v406_v1 = vmul.f32 0.5, %v392_v29 }
  0xf5   : > { %v415_v34 = vmul.f32 0.70710677, %v394_v31  ;;  %v397_v35 = vpop.f32.mrb[6].mxu0  ;;  %v407_v4 = vmul.f32 0.5, %v394_v31 }
  0xf6   : > { %681 = verf.f32 %v414_v32  ;;  %v398_v36 = vadd.f32 %v397_v35, %v291_v33  ;;  %v399_v37 = vpop.f32.mrb[7].mxu0 }
  0xf7   : > { %683 = verf.f32 %v415_v34  ;;  %v400_v38 = vadd.f32 %v399_v37, %v291_v33 }
  0xf8   : > { %v674_v39 = vpop.eup %673  ;;  %v416_v40 = vmul.f32 0.70710677, %v398_v36  ;;  %v408_v2 = vmul.f32 0.5, %v398_v36 }
  0xf9   : > { %v676_v41 = vpop.eup %675  ;;  %v417_v42 = vmul.f32 0.70710677, %v400_v38  ;;  %v426_v43 = vadd.f32 1.0, %v674_v39  ;;  %v409_v5 = vmul.f32 0.5, %v400_v38 }
  0xfa   : > { %685 = verf.f32 %v416_v40  ;;  %v427_v45 = vadd.f32 1.0, %v676_v41 }
  0xfb   : > { %687 = verf.f32 %v417_v42  ;;  %v434_v53 = vmul.f32 %v426_v43, %v402_v47 }
  0xfc   : > { %v678_v44 = vpop.eup %677  ;;  %v435_v56 = vmul.f32 %v427_v45, %v403_v50 }
  0xfd   : > { %v680_v46 = vpop.eup %679  ;;  %v428_v49 = vadd.f32 1.0, %v678_v44 }
  0xfe   : > { %v429_v52 = vadd.f32 1.0, %v680_v46 }
  0xff   : > { %v436_v54 = vmul.f32 %v428_v49, %v404_v48 }
 0x100   : > { %v682_v55 = vpop.eup %681  ;;  %v437_v57 = vmul.f32 %v429_v52, %v405_v51 }
 0x101   : > { %v684_v58 = vpop.eup %683  ;;  %v638_v59 = vpack.c.bf16 %v436_v54, %v434_v53  ;;  %v430_v61 = vadd.f32 1.0, %v682_v55 }
 0x102   : > { %v636_v60 = vpack.c.bf16 %v437_v57, %v435_v56  ;;  %v431_v63 = vadd.f32 1.0, %v684_v58 }
 0x103   : > { %v438_v7 = vmul.f32 %v430_v61, %v406_v1 }
 0x104   : > { %v686_v62 = vpop.eup %685  ;;  %637 = vmatprep.subr.bf16.mxu1 %v636_v60  ;;  %v439_v9 = vmul.f32 %v431_v63, %v407_v4 }
 0x105   : > { %v688_v0 = vpop.eup %687  ;;  %v432_v3 = vadd.f32 1.0, %v686_v62  ;;  %639 = vmatpush1.bf16.msra.mxu1 %v638_v59 }
 0x106   : > { %v433_v6 = vadd.f32 1.0, %v688_v0 }
 0x107   : > { %v440_v8 = vmul.f32 %v432_v3, %v408_v2 }
 0x108   : > { %v441_v10 = vmul.f32 %v433_v6, %v409_v5 }
 0x109   : > { %v642_v11 = vpack.c.bf16 %v440_v8, %v438_v7 }
 0x10a   : > { %v640_v12 = vpack.c.bf16 %v441_v10, %v439_v9 }
 0x10c   : > { %641 = vmatprep.subr.bf16.mxu1 %v640_v12 }
 0x10d   : > { %643 = vmatpush1.bf16.msra.mxu1 %v642_v11 }
 0x110   : > { %631 = vmatmul.mubr.msk.f32.vlgmr.msra.gmra.mrb[0].mxu1 %vm449_vm2, %v442_v13 }
 0x1e3   : > { %v519_v15 = vpop.f32.mrb[0].mxu1 }
 0x1e4   : > { %v520_v16 = vadd.f32 %v519_v15, %v447_v14  ;;  %v521_v17 = vpop.f32.mrb[1].mxu1 }
 0x1e5   : > { %v522_v18 = vadd.f32 %v521_v17, %v447_v14 }
 0x1e7   : > { %v526_v19 = vcombine.low %v520_v16, %v522_v18 }
 0x1e9   : > { %528 = vst [vmem:[%s262_s28] sm:$0xff] %v526_v19 }
 0x1ea PF: > { %s15_s20 = sadd.s32 1, %s711_s20   ;;  %s821_s18 = smov %s707_s19 }
 0x1eb   : > { %p12_p5 = scmp.ge.s32.totalorder %s15_s20, 4   ;;  %s822_s19 = smov %s824_s21 }
 0x1ed   :  { %14 = sbr.rel (!%p12_p5) target bundleno = 2 (0x2), region = 70 }

</bundles_post_ra>
